<compile_context>
chip_gen: v5e
topology: v5e:2x2
jax: 0.10.0
libtpu: 0.0.40
codegen_flags: <defaults>
</compile_context>

<pallas_src>
import jax
import jax.numpy as jnp
from jax.experimental import pallas as pl
from jax.experimental.pallas import tpu as pltpu


def _round_up(x, m):
    return ((x + m - 1) // m) * m


def _light_gnn_kernel(adj_ref, feat_ref, wt_ref, b_ref, out_ref, acc_ref):
    """Row-block of (adj @ features) @ W^T + b, reduced over the K grid axis."""
    k = pl.program_id(1)

    # Zero the (tm, D) accumulator on the first reduction step.
    @pl.when(k == 0)
    def _():
        acc_ref[...] = jnp.zeros_like(acc_ref)

    # Hot path: MXU matmul with f32 accumulation (inputs may be f32 or bf16).
    acc_ref[...] += jnp.dot(
        adj_ref[...], feat_ref[...], preferred_element_type=jnp.float32
    )

    # On the last reduction step, apply the fused fc layer and store once.
    @pl.when(k == pl.num_programs(1) - 1)
    def _():
        h = jnp.dot(acc_ref[...], wt_ref[...], preferred_element_type=jnp.float32)
        out_ref[...] = (h + b_ref[...]).astype(out_ref.dtype)


def light_gnn_forward(adj, features, fc_weight, fc_bias, *, cast_inputs_to_bf16=False):
    """h = (adj @ features) @ fc_weight.T + fc_bias  (fused Pallas kernel)."""
    N, K = adj.shape
    K2, D = features.shape
    assert K == N and K2 == N, "adjacency must be (N, N) and features (N, D)"
    out_dim, D2 = fc_weight.shape
    assert D2 == D, "fc weight must be (out_dim, D)"

    # ---- tile selection -----------------------------------------------------
    # Row tile: as large as possible (<=512) while keeping >=2 row blocks so the
    # 'parallel' axis shards across both TensorCores on v7x.
    if N < 256:
        tm = _round_up(N, 128)
    else:
        tm = min(512, _round_up((N + 1) // 2, 128))
    # Reduction tile: large to amortize DMA / grid-step overhead.
    tk = min(512, _round_up(N, 128))

    Nm = _round_up(N, tm)   # padded row count
    Nk = _round_up(N, tk)   # padded reduction length

    # ---- dtype / padding ----------------------------------------------------
    in_dtype = jnp.bfloat16 if cast_inputs_to_bf16 else jnp.float32
    adj_p = adj.astype(in_dtype)
    feat_p = features.astype(in_dtype)
    if Nm != N or Nk != N:
        adj_p = jnp.pad(adj_p, ((0, Nm - N), (0, Nk - N)))
    if Nk != N:
        feat_p = jnp.pad(feat_p, ((0, Nk - N), (0, 0)))
    wt = fc_weight.T.astype(jnp.float32)                 # (D, out_dim)
    b2 = fc_bias.reshape(1, out_dim).astype(jnp.float32)  # (1, out_dim)

    grid = (Nm // tm, Nk // tk)
    itemsize = 2 if cast_inputs_to_bf16 else 4

    # ---- VMEM budget (explicit, review item for v7x's 64 MiB) ---------------
    vmem_est = (
        2 * (tm * tk + tk * D) * itemsize   # double-buffered adjacency + features tiles
        + 2 * (D * out_dim + out_dim) * 4   # fc weight + bias (resident, double-buffered)
        + 2 * tm * out_dim * 4              # double-buffered output block
        + tm * D * 4                        # f32 accumulator scratch
    )
    vmem_limit = min(64 * 1024 * 1024, max(32 * 1024 * 1024, int(1.5 * vmem_est)))

    out_padded = pl.pallas_call(
        _light_gnn_kernel,
        out_shape=jax.ShapeDtypeStruct((Nm, out_dim), jnp.float32),
        grid_spec=pltpu.PrefetchScalarGridSpec(
            num_scalar_prefetch=0,
            grid=grid,
            in_specs=[
                # adjacency tile (streamed exactly once; Buffered(3) is a cheap
                # follow-up if DMA latency shows up exposed on v7x).
                pl.BlockSpec((tm, tk), lambda i, k: (i, k)),
                # features slab: tn = D (full feature width)
                pl.BlockSpec((tk, D), lambda i, k: (k, 0)),
                # fc weight (transposed) and bias: resident across the grid
                pl.BlockSpec((D, out_dim), lambda i, k: (0, 0)),
                pl.BlockSpec((1, out_dim), lambda i, k: (0, 0)),
            ],
            out_specs=pl.BlockSpec((tm, out_dim), lambda i, k: (i, 0)),
            scratch_shapes=[pltpu.VMEM((tm, D), jnp.float32)],
        ),
        compiler_params=pltpu.CompilerParams(
            dimension_semantics=("parallel", "arbitrary"),
            vmem_limit_bytes=vmem_limit,
        ),
        cost_estimate=pl.CostEstimate(
            flops=2 * N * N * D + 2 * N * D * out_dim,
            bytes_accessed=itemsize * (N * N + N * D)
            + 4 * (D * out_dim + out_dim + N * out_dim),
            transcendentals=0,
        ),
    )(adj_p, feat_p, wt, b2)

    return out_padded[:N]


if __name__ == "__main__":
    key = jax.random.PRNGKey(0)
    k_adj, k_feat, k_w, k_b = jax.random.split(key, 4)

    # Small graph: 256 nodes, 256-dim input features, 64-dim GNN output.
    N, D, OUT = 256, 256, 64
    adj = jax.random.uniform(k_adj, (N, N), dtype=jnp.float32)
    feat = jax.random.normal(k_feat, (N, D), dtype=jnp.float32)
    # nn.Linear(input_dim=D, gnn_output_dim=OUT): weight (OUT, D), bias (OUT,)
    w = jax.random.normal(k_w, (OUT, D), dtype=jnp.float32) * (1.0 / jnp.sqrt(D))
    b = jax.random.normal(k_b, (OUT,), dtype=jnp.float32) * 0.01

    h = light_gnn_forward(adj, feat, w, b)
    h = jax.block_until_ready(h)

    # Correctness check against the plain-JAX reference of the PyTorch forward.
    h_ref = (adj @ feat) @ w.T + b
    assert h.shape == (N, OUT)
    assert jnp.allclose(h, h_ref, atol=2e-2, rtol=2e-3), float(
        jnp.max(jnp.abs(h - h_ref))
    )

    print("KERNEL_OK")
</pallas_src>

<mosaic_0001>
module attributes {stable_mosaic.version = 11 : i64} {
  func.func @_light_gnn_kernel(%arg0: i32, %arg1: i32, %arg2: memref<128x256xf32, #tpu.memory_space<vmem>>, %arg3: memref<256x256xf32, #tpu.memory_space<vmem>>, %arg4: memref<256x64xf32, #tpu.memory_space<vmem>>, %arg5: memref<1x64xf32, #tpu.memory_space<vmem>>, %arg6: memref<128x64xf32, #tpu.memory_space<vmem>>, %arg7: memref<128x256xf32, #tpu.memory_space<vmem>>) attributes {dimension_semantics = [#tpu.dimension_semantics<parallel>, #tpu.dimension_semantics<arbitrary>], iteration_bounds = array<i64: 2, 1>, scalar_prefetch = 0 : i64, scratch_operands = 1 : i64, tpu.core_type = #tpu.core_type<tc>, window_params = [{transform_indices = @transform_0, window_bounds = array<i64: 128, 256>}, {transform_indices = @transform_1, window_bounds = array<i64: 256, 256>}, {pipeline_mode = #tpu.pipeline_mode<synchronous>, transform_indices = @transform_2, window_bounds = array<i64: 256, 64>}, {pipeline_mode = #tpu.pipeline_mode<synchronous>, transform_indices = @transform_3, window_bounds = array<i64: 1, 64>}, {transform_indices = @transform_4, window_bounds = array<i64: 128, 64>}]} {
    %c0_i32 = arith.constant 0 : i32
    %0 = arith.cmpi eq, %arg1, %c0_i32 : i32
    %1 = arith.extui %0 : i1 to i32
    %c0_i32_0 = arith.constant 0 : i32
    %2 = arith.cmpi ne, %1, %c0_i32_0 : i32
    scf.if %2 {
      %cst_10 = arith.constant 0.000000e+00 : f32
      %12 = vector.broadcast %cst_10 : f32 to vector<128x256xf32>
      %c0_11 = arith.constant 0 : index
      %c0_12 = arith.constant 0 : index
      %13 = vector.load %arg7[%c0_11, %c0_12] : memref<128x256xf32, #tpu.memory_space<vmem>>, vector<128x256xf32>
      tpu.vector_store %arg7[%c0_11, %c0_12], %12 {strides = array<i32>} : memref<128x256xf32, #tpu.memory_space<vmem>>, vector<128x256xf32>,
    } else {
    }
    %c0 = arith.constant 0 : index
    %c0_1 = arith.constant 0 : index
    %3 = vector.load %arg7[%c0, %c0_1] : memref<128x256xf32, #tpu.memory_space<vmem>>, vector<128x256xf32>
    %c0_2 = arith.constant 0 : index
    %c0_3 = arith.constant 0 : index
    %4 = vector.load %arg2[%c0_2, %c0_3] : memref<128x256xf32, #tpu.memory_space<vmem>>, vector<128x256xf32>
    %c0_4 = arith.constant 0 : index
    %c0_5 = arith.constant 0 : index
    %5 = vector.load %arg3[%c0_4, %c0_5] : memref<256x256xf32, #tpu.memory_space<vmem>>, vector<256x256xf32>
    %cst = arith.constant dense<0.000000e+00> : vector<128x256xf32>
    %6 = tpu.matmul %4, %5, %cst {dimension_numbers = #tpu.dot_dimension_numbers<[1], [0], [0], [1], [0, 0, 1, 1], [], []>} : vector<128x256xf32>, vector<256x256xf32>, vector<128x256xf32> -> vector<128x256xf32>
    %7 = arith.addf %3, %6 : vector<128x256xf32>
    %c0_6 = arith.constant 0 : index
    %c0_7 = arith.constant 0 : index
    %8 = vector.load %arg7[%c0_6, %c0_7] : memref<128x256xf32, #tpu.memory_space<vmem>>, vector<128x256xf32>
    tpu.vector_store %arg7[%c0_6, %c0_7], %7 {strides = array<i32>} : memref<128x256xf32, #tpu.memory_space<vmem>>, vector<128x256xf32>,
    %c0_i32_8 = arith.constant 0 : i32
    %9 = arith.cmpi eq, %arg1, %c0_i32_8 : i32
    %10 = arith.extui %9 : i1 to i32
    %c0_i32_9 = arith.constant 0 : i32
    %11 = arith.cmpi ne, %10, %c0_i32_9 : i32
    scf.if %11 {
      %c0_10 = arith.constant 0 : index
      %c0_11 = arith.constant 0 : index
      %12 = vector.load %arg7[%c0_10, %c0_11] : memref<128x256xf32, #tpu.memory_space<vmem>>, vector<128x256xf32>
      %c0_12 = arith.constant 0 : index
      %c0_13 = arith.constant 0 : index
      %13 = vector.load %arg4[%c0_12, %c0_13] : memref<256x64xf32, #tpu.memory_space<vmem>>, vector<256x64xf32>
      %cst_14 = arith.constant dense<0.000000e+00> : vector<128x64xf32>
      %14 = tpu.matmul %12, %13, %cst_14 {dimension_numbers = #tpu.dot_dimension_numbers<[1], [0], [0], [1], [0, 0, 1, 1], [], []>} : vector<128x256xf32>, vector<256x64xf32>, vector<128x64xf32> -> vector<128x64xf32>
      %c0_15 = arith.constant 0 : index
      %c0_16 = arith.constant 0 : index
      %15 = vector.load %arg5[%c0_15, %c0_16] : memref<1x64xf32, #tpu.memory_space<vmem>>, vector<1x64xf32>
      %16 = vector.broadcast %15 : vector<1x64xf32> to vector<128x64xf32>
      %17 = arith.addf %14, %16 : vector<128x64xf32>
      %c0_17 = arith.constant 0 : index
      %c0_18 = arith.constant 0 : index
      %18 = vector.load %arg6[%c0_17, %c0_18] : memref<128x64xf32, #tpu.memory_space<vmem>>, vector<128x64xf32>
      tpu.vector_store %arg6[%c0_17, %c0_18], %17 {strides = array<i32>} : memref<128x64xf32, #tpu.memory_space<vmem>>, vector<128x64xf32>,
    } else {
    }
    return
  }
  func.func @transform_0(%arg0: i32, %arg1: i32) -> (i32, i32) {
    %c0_i32 = arith.constant 0 : i32
    return %arg0, %arg1 : i32, i32
  }
  func.func @transform_1(%arg0: i32, %arg1: i32) -> (i32, i32) {
    %c0_i32 = arith.constant 0 : i32
    %c0_i32_0 = arith.constant 0 : i32
    return %arg1, %c0_i32 : i32, i32
  }
  func.func @transform_2(%arg0: i32, %arg1: i32) -> (i32, i32) {
    %c0_i32 = arith.constant 0 : i32
    %c0_i32_0 = arith.constant 0 : i32
    %c0_i32_1 = arith.constant 0 : i32
    return %c0_i32, %c0_i32_0 : i32, i32
  }
  func.func @transform_3(%arg0: i32, %arg1: i32) -> (i32, i32) {
    %c0_i32 = arith.constant 0 : i32
    %c0_i32_0 = arith.constant 0 : i32
    %c0_i32_1 = arith.constant 0 : i32
    return %c0_i32, %c0_i32_0 : i32, i32
  }
  func.func @transform_4(%arg0: i32, %arg1: i32) -> (i32, i32) {
    %c0_i32 = arith.constant 0 : i32
    %c0_i32_0 = arith.constant 0 : i32
    return %arg0, %c0_i32 : i32, i32
  }
}

</mosaic_0001>

<bundles_post_ra>
// kernel: tpu_custom_call.1
= control target key start
LH: loop header
LB: loop body
LE: loop exit
PB: predicated region body
PF: predicated region fallthrough
CT: control target
= control target key end

     0   :  { %s1754_s0 = inlined_call_operand.hbm [shape: f32[256,256], index: 0, kind: input, shape index: {}]   ;;  %s1755_s1 = inlined_call_operand.hbm [shape: f32[256,256], index: 1, kind: input, shape index: {}]   ;;  %s1756_s2 = inlined_call_operand.vmem [shape: f32[256,64], index: 2, kind: input, shape index: {}]   ;;  %s1757_s3 = inlined_call_operand.vmem [shape: f32[1,64], index: 3, kind: input, shape index: {}]   ;;  %s1758_s4 = inlined_call_operand.vmem [shape: f32[256,64], index: 4, kind: output, shape index: {}]  }
   0x1   :  { %1759 = sst [smem:[#allocation9_spill]] %s1755_s1 }
   0x2   :  { %9 = vsyncpa [#allocation4], 0 }
   0x3   :  { %11 = vsyncpa [#allocation4 + $0x1], 0 }
   0x4   :  { %12 = vsyncpa [#allocation6], 0  ;;  %s1327_s15 = smov 0   ;;  %s1329_s16 = smov 0  }
   0x5   :  { %s1331_s17 = smov 0   ;;  %s1333_s18 = smov 0  }
   0x6   :  { %s1335_s19 = smov 0   ;;  %s1337_s20 = smov 0  }
   0x7 LB: > { %s1064_s21 = sadd.s32 4294967295, %s1297_s20   ;;  %p52_p0 = scmp.ne.s32.totalorder %s1281_s16, %s1277_s15  ;;  %s1297_s20 = sphi %s1337_s20, %s18_s20   ;;  %s1293_s19 = sphi %s1335_s19, %s1769_s19   ;;  %s1289_s18 = sphi %s1333_s18, %s1768_s18   ;;  %s1285_s17 = sphi %s1331_s17, %s1767_s17   ;;  %s1281_s16 = sphi %s1329_s16, %s1766_s16   ;;  %s1277_s15 = sphi %s1327_s15, %s1765_s15  }
   0x8   : > { %p1357_p1 = scmp.eq.s32.totalorder %s1064_s21, 0  ;;  %p1066_p2 = scmp.ge.s32.totalorder %s1297_s20, 1 }
   0x9   : > { %p157_p3 = scmp.lt.s32.totalorder %s1297_s20, 3  ;;  %s1762_s1 = sld [smem:[#allocation9_spill]] }
   0xa   : > { %p1365_p4 = por %p1357_p1, %p52_p0  ;;  %s1299_s28 = smov [#allocation5]  }
   0xb   : > { %p1372_p5 = pnand %p1066_p2, %p157_p3  ;;  %s174_s29 = sshll.u32 %s1299_s28, 4  ;;  %s175_s29 = int_to_ptr.vmem [resolvable:$true] %s174_s29 }
   0xc   : > { %s1300_s30 = smov 256   ;;  %s1301_s5 = smov 16  }
   0xd   : > { %p1120_p6 = pneg %p1372_p5  ;;  %s30_s6 = sadd.s32 1, %s1293_s19 }
   0xe   : > { %p32_p8 = scmp.ge.s32.totalorder %s30_s6, 2  ;;  %p46_p9 = scmp.ne.s32.totalorder %s1285_s17, %s1281_s16 }
   0xf   : > { %s172_s26 = sshll.u32 %s1762_s1, 4  ;;  %p1121_p7 = pnand %p1120_p6, %p1357_p1  ;;  %s173_s26 = int_to_ptr.hbm [resolvable:$true] %s172_s26 }
  0x10   : > { %p47_p10 = scmp.eq.s32.totalorder %s1297_s20, 0  ;;  %s1771_s6 = smov (%p32_p8, %s30_s6), 0 }
  0x11   : > { %1123 = dma.hbm_to_vmem [thread:$0]  (!%p1121_p7), %s173_s26, 8192, %s175_s29, [#allocation6], %s1300_s30, %s1300_s30, %s1301_s5  }
  0x12   : > { %s39_s7 = sadd.s32 1, %s1285_s17  ;;  %p1387_p11 = por %p47_p10, %p46_p9 }
  0x13   : > { %s34_s9 = ssub.s32 %s1293_s19, %s1771_s6  ;;  %s194_s10 = sand.u32 1, %s1285_s17  }
  0x14   : > { %p37_p12 = scmp.eq.s32.totalorder %s34_s9, 0  ;;  %p1129_p13 = scmp.lt.s32.totalorder %s1297_s20, 2 }
  0x15   : > { %s1069_s11 = sshll.u32 %s194_s10, 8  ;;  %s1081_s12 = sshll.u32 %s1293_s19, 8 }
  0x16   : > { %s1397_s13 = scalar_select %p37_p12, %s1285_s17, %s39_s7  }
  0x17   : > { %s206_s21 = scalar_lea.hbm %s1754_s0, %s1081_s12  ;;  %s198_s25 = scalar_lea.vmem [#allocation3], %s1069_s11 }
  0x18   : > { %s207_s24 = sshll.u32 %s206_s21, 4  ;;  %s209_s26 = sshll.u32 %s198_s25, 4  ;;  %s208_s24 = int_to_ptr.hbm [resolvable:$true] %s207_s24  ;;  %s210_s26 = int_to_ptr.vmem [resolvable:$true] %s209_s26 }
  0x19   : > { %p1125_p0 = pnand %p1129_p13, %p1387_p11  ;;  %s195_s28 = scalar_lea.sflag [#allocation4], %s194_s10 }
  0x1a   : > { %221 = sbr.rel (%p1372_p5) target bundleno = 515 (0x203), region = 36  ;;  %s223_s29 = sand.u32 (!%p1372_p5), 1, %s1281_s16  }
  0x1b   : > { %1127 = dma.hbm_to_vmem [thread:$0]  (!%p1125_p0), %s208_s24, 4096, %s210_s26, %s195_s28, %s1300_s30, %s1300_s30, %s1301_s5  }
  0x1c   : > { %s1074_s7 = sshll.u32 (!%p1372_p5), %s223_s29, 8  ;;  %s224_s9 = scalar_lea.sflag (!%p1372_p5), [#allocation4], %s223_s29 }
  0x1d   : > { %s1407_s1 = scalar_lea.vmem (!%p1372_p5), [#allocation3], %s1074_s7 }
  0x1f   : > { %1268 = dma.done.wait (%p1365_p4), %s224_s9, 4096  }
  0x20   : > { %1270 = vsyncadd (%p1365_p4), %s224_s9, 4294963200 }
  0x21   : > { %1272 = dma.done.wait (%p1357_p1), [#allocation6], 8192  }
  0x22   : > { %1274 = vsyncadd (%p1357_p1), [#allocation6], 4294959104  ;;  %v397_v0 = vld [vmem:[#allocation5 + $0xf0] sm:$0xff]  ;;  %v395_v2 = vld [vmem:[#allocation5 + $0xe0] sm:$0xff]  ;;  %vm956_vm0 = vcmask 523264  }
  0x23   : > { %v429_v1 = vld [vmem:[#allocation5 + $0x1f0] sm:$0xff]  ;;  %431 = vmatpush.msra.mxu0 %v397_v0  ;;  %1082 = vmatpush.msra.mxu2 %v397_v0  ;;  %v427_v3 = vld [vmem:[#allocation5 + $0x1e0] sm:$0xff]  ;;  %v1424_v34 = vld [vmem:[%s1407_s1 + $0x8] sm:$0xff] }
  0x24   : > { %496 = vmatpush.msra.mxu1 %v429_v1  ;;  %1098 = vmatpush.msra.mxu3 %v429_v1  ;;  %v393_v4 = vld [vmem:[#allocation5 + $0xd0] sm:$0xff]  ;;  %v391_v6 = vld [vmem:[#allocation5 + $0xc0] sm:$0xff]  ;;  %v1427_v35 = vld [vmem:[%s1407_s1 + $0x88] sm:$0xff] }
  0x25   : > { %432 = vmatpush.msra.mxu0 %v395_v2  ;;  %1083 = vmatpush.msra.mxu2 %v395_v2  ;;  %v425_v5 = vld [vmem:[#allocation5 + $0x1d0] sm:$0xff]  ;;  %v423_v7 = vld [vmem:[#allocation5 + $0x1c0] sm:$0xff]  ;;  %v398_v36 = vld [vmem:[#allocation5 + $0xf8] sm:$0xff] }
  0x26   : > { %497 = vmatpush.msra.mxu1 %v427_v3  ;;  %1099 = vmatpush.msra.mxu3 %v427_v3  ;;  %v389_v8 = vld [vmem:[#allocation5 + $0xb0] sm:$0xff]  ;;  %v387_v10 = vld [vmem:[#allocation5 + $0xa0] sm:$0xff]  ;;  %v430_v37 = vld [vmem:[#allocation5 + $0x1f8] sm:$0xff] }
  0x27   : > { %433 = vmatpush.msra.mxu0 %v393_v4  ;;  %1084 = vmatpush.msra.mxu2 %v393_v4  ;;  %v421_v9 = vld [vmem:[#allocation5 + $0x1b0] sm:$0xff]  ;;  %v419_v11 = vld [vmem:[#allocation5 + $0x1a0] sm:$0xff]  ;;  %v396_v38 = vld [vmem:[#allocation5 + $0xe8] sm:$0xff] }
  0x28   : > { %498 = vmatpush.msra.mxu1 %v425_v5  ;;  %1100 = vmatpush.msra.mxu3 %v425_v5  ;;  %v385_v12 = vld [vmem:[#allocation5 + $0x90] sm:$0xff]  ;;  %v383_v14 = vld [vmem:[#allocation5 + $0x80] sm:$0xff]  ;;  %v428_v39 = vld [vmem:[#allocation5 + $0x1e8] sm:$0xff] }
  0x29   : > { %434 = vmatpush.msra.mxu0 %v391_v6  ;;  %1085 = vmatpush.msra.mxu2 %v391_v6  ;;  %v417_v13 = vld [vmem:[#allocation5 + $0x190] sm:$0xff]  ;;  %v415_v15 = vld [vmem:[#allocation5 + $0x180] sm:$0xff]  ;;  %v394_v40 = vld [vmem:[#allocation5 + $0xd8] sm:$0xff] }
  0x2a   : > { %499 = vmatpush.msra.mxu1 %v423_v7  ;;  %1101 = vmatpush.msra.mxu3 %v423_v7  ;;  %v381_v16 = vld [vmem:[#allocation5 + $0x70] sm:$0xff]  ;;  %v379_v18 = vld [vmem:[#allocation5 + $0x60] sm:$0xff]  ;;  %v426_v41 = vld [vmem:[#allocation5 + $0x1d8] sm:$0xff] }
  0x2b   : > { %435 = vmatpush.msra.mxu0 %v389_v8  ;;  %1086 = vmatpush.msra.mxu2 %v389_v8  ;;  %v413_v17 = vld [vmem:[#allocation5 + $0x170] sm:$0xff]  ;;  %v411_v19 = vld [vmem:[#allocation5 + $0x160] sm:$0xff]  ;;  %v1440_v44 = vld [vmem:[%s1407_s1 + $0x18] sm:$0xff] }
  0x2c   : > { %500 = vmatpush.msra.mxu1 %v421_v9  ;;  %1102 = vmatpush.msra.mxu3 %v421_v9  ;;  %v377_v20 = vld [vmem:[#allocation5 + $0x50] sm:$0xff]  ;;  %v375_v22 = vld [vmem:[#allocation5 + $0x40] sm:$0xff]  ;;  %v1443_v45 = vld [vmem:[%s1407_s1 + $0x98] sm:$0xff] }
  0x2d   : > { %436 = vmatpush.msra.mxu0 %v387_v10  ;;  %1087 = vmatpush.msra.mxu2 %v387_v10  ;;  %v409_v21 = vld [vmem:[#allocation5 + $0x150] sm:$0xff]  ;;  %v407_v23 = vld [vmem:[#allocation5 + $0x140] sm:$0xff]  ;;  %v392_v46 = vld [vmem:[#allocation5 + $0xc8] sm:$0xff] }
  0x2e   : > { %501 = vmatpush.msra.mxu1 %v419_v11  ;;  %1103 = vmatpush.msra.mxu3 %v419_v11  ;;  %v373_v24 = vld [vmem:[#allocation5 + $0x30] sm:$0xff]  ;;  %v371_v26 = vld [vmem:[#allocation5 + $0x20] sm:$0xff]  ;;  %v424_v47 = vld [vmem:[#allocation5 + $0x1c8] sm:$0xff] }
  0x2f   : > { %437 = vmatpush.msra.mxu0 %v385_v12  ;;  %1088 = vmatpush.msra.mxu2 %v385_v12  ;;  %v405_v25 = vld [vmem:[#allocation5 + $0x130] sm:$0xff]  ;;  %v403_v27 = vld [vmem:[#allocation5 + $0x120] sm:$0xff]  ;;  %v390_v48 = vld [vmem:[#allocation5 + $0xb8] sm:$0xff] }
  0x30   : > { %502 = vmatpush.msra.mxu1 %v417_v13  ;;  %1104 = vmatpush.msra.mxu3 %v417_v13  ;;  %v369_v28 = vld [vmem:[#allocation5 + $0x10] sm:$0xff]  ;;  %v367_v30 = vld [vmem:[#allocation5] sm:$0xff]  ;;  %v422_v49 = vld [vmem:[#allocation5 + $0x1b8] sm:$0xff] }
  0x31   : > { %438 = vmatpush.msra.mxu0 %v383_v14  ;;  %1089 = vmatpush.msra.mxu2 %v383_v14  ;;  %v401_v29 = vld [vmem:[#allocation5 + $0x110] sm:$0xff]  ;;  %v399_v31 = vld [vmem:[#allocation5 + $0x100] sm:$0xff]  ;;  %v388_v50 = vld [vmem:[#allocation5 + $0xa8] sm:$0xff] }
  0x32   : > { %503 = vmatpush.msra.mxu1 %v415_v15  ;;  %1105 = vmatpush.msra.mxu3 %v415_v15  ;;  %v1418_v32 = vld [vmem:[%s1407_s1] sm:$0xff]  ;;  %v1434_v42 = vld [vmem:[%s1407_s1 + $0x10] sm:$0xff]  ;;  %v420_v51 = vld [vmem:[#allocation5 + $0x1a8] sm:$0xff] }
  0x33   : > { %439 = vmatpush.msra.mxu0 %v381_v16  ;;  %1090 = vmatpush.msra.mxu2 %v381_v16  ;;  %v1421_v33 = vld [vmem:[%s1407_s1 + $0x80] sm:$0xff]  ;;  %v1437_v43 = vld [vmem:[%s1407_s1 + $0x90] sm:$0xff]  ;;  %v1456_v54 = vld [vmem:[%s1407_s1 + $0x28] sm:$0xff] }
  0x34   : > { %504 = vmatpush.msra.mxu1 %v413_v17  ;;  %1106 = vmatpush.msra.mxu3 %v413_v17  ;;  %v1450_v52 = vld [vmem:[%s1407_s1 + $0x20] sm:$0xff]  ;;  %v1459_v55 = vld [vmem:[%s1407_s1 + $0xa8] sm:$0xff]  ;;  %v386_v56 = vld [vmem:[#allocation5 + $0x98] sm:$0xff] }
  0x35   : > { %440 = vmatpush.msra.mxu0 %v379_v18  ;;  %1091 = vmatpush.msra.mxu2 %v379_v18  ;;  %v1453_v53 = vld [vmem:[%s1407_s1 + $0xa0] sm:$0xff]  ;;  %v418_v57 = vld [vmem:[#allocation5 + $0x198] sm:$0xff]  ;;  %v384_v58 = vld [vmem:[#allocation5 + $0x88] sm:$0xff] }
  0x36   : > { %505 = vmatpush.msra.mxu1 %v411_v19  ;;  %1107 = vmatpush.msra.mxu3 %v411_v19  ;;  %v416_v59 = vld [vmem:[#allocation5 + $0x188] sm:$0xff]  ;;  %v382_v60 = vld [vmem:[#allocation5 + $0x78] sm:$0xff]  ;;  %v1466_v62 = vld [vmem:[%s1407_s1 + $0x30] sm:$0xff] }
  0x37   : > { %441 = vmatpush.msra.mxu0 %v377_v20  ;;  %1092 = vmatpush.msra.mxu2 %v377_v20  ;;  %v414_v61 = vld [vmem:[#allocation5 + $0x178] sm:$0xff]  ;;  %v1469_v63 = vld [vmem:[%s1407_s1 + $0xb0] sm:$0xff]  ;;  %v380_v2 = vld [vmem:[#allocation5 + $0x68] sm:$0xff] }
  0x38   : > { %506 = vmatpush.msra.mxu1 %v409_v21  ;;  %1108 = vmatpush.msra.mxu3 %v409_v21  ;;  %v1472_v0 = vld [vmem:[%s1407_s1 + $0x38] sm:$0xff]  ;;  %v412_v3 = vld [vmem:[#allocation5 + $0x168] sm:$0xff]  ;;  %v1482_v8 = vld [vmem:[%s1407_s1 + $0x40] sm:$0xff] }
  0x39   : > { %442 = vmatpush.msra.mxu0 %v375_v22  ;;  %1093 = vmatpush.msra.mxu2 %v375_v22  ;;  %v1475_v1 = vld [vmem:[%s1407_s1 + $0xb8] sm:$0xff]  ;;  %v376_v6 = vld [vmem:[#allocation5 + $0x48] sm:$0xff]  ;;  %v1485_v9 = vld [vmem:[%s1407_s1 + $0xc0] sm:$0xff] }
  0x3a   : > { %507 = vmatpush.msra.mxu1 %v407_v23  ;;  %1109 = vmatpush.msra.mxu3 %v407_v23  ;;  %v378_v4 = vld [vmem:[#allocation5 + $0x58] sm:$0xff]  ;;  %v408_v7 = vld [vmem:[#allocation5 + $0x148] sm:$0xff]  ;;  %v1498_v18 = vld [vmem:[%s1407_s1 + $0x50] sm:$0xff] }
  0x3b   : > { %443 = vmatpush.msra.mxu0 %v373_v24  ;;  %1094 = vmatpush.msra.mxu2 %v373_v24  ;;  %v410_v5 = vld [vmem:[#allocation5 + $0x158] sm:$0xff]  ;;  %v1488_v10 = vld [vmem:[%s1407_s1 + $0x48] sm:$0xff]  ;;  %v1501_v19 = vld [vmem:[%s1407_s1 + $0xd0] sm:$0xff] }
  0x3c   : > { %508 = vmatpush.msra.mxu1 %v405_v25  ;;  %1110 = vmatpush.msra.mxu3 %v405_v25  ;;  %v1491_v11 = vld [vmem:[%s1407_s1 + $0xc8] sm:$0xff]  ;;  %v374_v12 = vld [vmem:[#allocation5 + $0x38] sm:$0xff]  ;;  %v1514_v24 = vld [vmem:[%s1407_s1 + $0x60] sm:$0xff] }
  0x3d   : > { %444 = vmatpush.msra.mxu0 %v371_v26  ;;  %1095 = vmatpush.msra.mxu2 %v371_v26  ;;  %v406_v13 = vld [vmem:[#allocation5 + $0x138] sm:$0xff]  ;;  %v372_v14 = vld [vmem:[#allocation5 + $0x28] sm:$0xff]  ;;  %v1517_v25 = vld [vmem:[%s1407_s1 + $0xe0] sm:$0xff] }
  0x3e   : > { %509 = vmatpush.msra.mxu1 %v403_v27  ;;  %1111 = vmatpush.msra.mxu3 %v403_v27  ;;  %v404_v15 = vld [vmem:[#allocation5 + $0x128] sm:$0xff]  ;;  %v370_v16 = vld [vmem:[#allocation5 + $0x18] sm:$0xff] }
  0x3f   : > { %445 = vmatpush.msra.mxu0 %v369_v28  ;;  %1096 = vmatpush.msra.mxu2 %v369_v28  ;;  %v402_v17 = vld [vmem:[#allocation5 + $0x118] sm:$0xff]  ;;  %v368_v22 = vld [vmem:[#allocation5 + $0x8] sm:$0xff]  ;;  %v349_v28 = vld [vmem:[%s1407_s1 + $0x70] sm:$0xff] }
  0x40   : > { %510 = vmatpush.msra.mxu1 %v401_v29  ;;  %1112 = vmatpush.msra.mxu3 %v401_v29  ;;  %v1504_v20 = vld [vmem:[%s1407_s1 + $0x58] sm:$0xff]  ;;  %v400_v23 = vld [vmem:[#allocation5 + $0x108] sm:$0xff]  ;;  %v1531_v29 = vld [vmem:[%s1407_s1 + $0xf0] sm:$0xff] }
  0x41   : > { %446 = vmatpush.msra.mxu0 %v367_v30  ;;  %1097 = vmatpush.msra.mxu2 %v367_v30  ;;  %v1507_v21 = vld [vmem:[%s1407_s1 + $0xd8] sm:$0xff]  ;;  %v1520_v26 = vld [vmem:[%s1407_s1 + $0x68] sm:$0xff] }
  0x42   : > { %511 = vmatpush.msra.mxu1 %v399_v31  ;;  %1113 = vmatpush.msra.mxu3 %v399_v31  ;;  %v1523_v27 = vld [vmem:[%s1407_s1 + $0xe8] sm:$0xff]  ;;  %v350_v30 = vld [vmem:[%s1407_s1 + $0x78] sm:$0xff] }
  0x43   : > { %447 = vmatmul.f32.vlgmr.msra.gmra.mxu0 %v1418_v32  ;;  %471 = vmatmul.f32.vlgmr.msra.gmra.mxu2 %v1421_v33  ;;  %v1535_v31 = vld [vmem:[%s1407_s1 + $0xf8] sm:$0xff]  ;;  %s1076_s1 = sshll.u32 %s1289_s18, 4 }
  0x44   : > { %512 = vmatmul.f32.vlgmr.msra.gmra.mxu1 %v1424_v34  ;;  %536 = vmatmul.f32.vlgmr.msra.gmra.mxu3 %v1427_v35  ;;  %p262_p1 = scmp.lt.s32.totalorder %s1076_s1, 31 }
  0x45   : > { %561 = vmatpush.msrb.mxu2 %v398_v36  ;;  %626 = vmatpush.msrb.mxu3 %v430_v37  ;;  %v805_v36 = vld [vmem:[%s1756_s2 + $0x78] sm:$0xff]  ;;  %v804_v37 = vld [vmem:[%s1756_s2 + $0x70] sm:$0xff] }
  0x46   : > { %826 = vmatpush.msrb.mxu0 %v805_v36  ;;  %s1773_s1 = smov (!%p262_p1, %s1076_s1), 31 }
  0x47   : > { %562 = vmatpush.msrb.mxu2 %v396_v38  ;;  %627 = vmatpush.msrb.mxu3 %v428_v39  ;;  %v803_v38 = vld [vmem:[%s1756_s2 + $0x68] sm:$0xff]  ;;  %v800_v39 = vld [vmem:[%s1756_s2 + $0x50] sm:$0xff]  ;;  %s1077_s10 = sshll.u32 %s1773_s1, 3 }
  0x48   : > { %827 = vmatpush.msrb.mxu0 %v804_v37  ;;  %s1687_s18 = scalar_lea.vmem %s1758_s4, %s1077_s10 }
  0x49   : > { %563 = vmatpush.msrb.mxu2 %v394_v40  ;;  %628 = vmatpush.msrb.mxu3 %v426_v41  ;;  %v799_v40 = vld [vmem:[%s1756_s2 + $0x48] sm:$0xff]  ;;  %v798_v41 = vld [vmem:[%s1756_s2 + $0x40] sm:$0xff] }
  0x4a   : > { %828 = vmatpush.msrb.mxu0 %v803_v38 }
  0x4b   : > { %450 = vmatmul.f32.gmra.mxu0 %v1434_v42  ;;  %474 = vmatmul.f32.gmra.mxu2 %v1437_v43 }
  0x4c   : > { %515 = vmatmul.f32.gmra.mxu1 %v1440_v44  ;;  %539 = vmatmul.f32.gmra.mxu3 %v1443_v45 }
  0x4d   : > { %564 = vmatpush.msrb.mxu2 %v392_v46  ;;  %629 = vmatpush.msrb.mxu3 %v424_v47  ;;  %v795_v46 = vld [vmem:[%s1756_s2 + $0x28] sm:$0xff]  ;;  %v794_v47 = vld [vmem:[%s1756_s2 + $0x20] sm:$0xff] }
  0x4f   : > { %565 = vmatpush.msrb.mxu2 %v390_v48  ;;  %630 = vmatpush.msrb.mxu3 %v422_v49  ;;  %v793_v48 = vld [vmem:[%s1756_s2 + $0x18] sm:$0xff]  ;;  %v792_v49 = vld [vmem:[%s1756_s2 + $0x10] sm:$0xff] }
  0x51   : > { %566 = vmatpush.msrb.mxu2 %v388_v50  ;;  %631 = vmatpush.msrb.mxu3 %v420_v51  ;;  %v791_v50 = vld [vmem:[%s1756_s2 + $0x8] sm:$0xff]  ;;  %v790_v51 = vld [vmem:[%s1756_s2] sm:$0xff] }
  0x53   : > { %453 = vmatmul.f32.gmra.mxu0 %v1450_v52  ;;  %477 = vmatmul.f32.gmra.mxu2 %v1453_v53 }
  0x54   : > { %518 = vmatmul.f32.gmra.mxu1 %v1456_v54  ;;  %542 = vmatmul.f32.gmra.mxu3 %v1459_v55 }
  0x55   : > { %567 = vmatpush.msrb.mxu2 %v386_v56  ;;  %632 = vmatpush.msrb.mxu3 %v418_v57  ;;  %v819_v56 = vld [vmem:[%s1756_s2 + $0xe8] sm:$0xff]  ;;  %v818_v57 = vld [vmem:[%s1756_s2 + $0xe0] sm:$0xff] }
  0x57   : > { %568 = vmatpush.msrb.mxu2 %v384_v58  ;;  %633 = vmatpush.msrb.mxu3 %v416_v59  ;;  %v817_v58 = vld [vmem:[%s1756_s2 + $0xd8] sm:$0xff]  ;;  %v816_v59 = vld [vmem:[%s1756_s2 + $0xd0] sm:$0xff] }
  0x59   : > { %569 = vmatpush.msrb.mxu2 %v382_v60  ;;  %634 = vmatpush.msrb.mxu3 %v414_v61 }
  0x5b   : > { %456 = vmatmul.f32.gmra.mxu0 %v1466_v62  ;;  %480 = vmatmul.f32.gmra.mxu2 %v1469_v63 }
  0x5c   : > { %521 = vmatmul.f32.gmra.mxu1 %v1472_v0  ;;  %545 = vmatmul.f32.gmra.mxu3 %v1475_v1 }
  0x5d   : > { %570 = vmatpush.msrb.mxu2 %v380_v2  ;;  %635 = vmatpush.msrb.mxu3 %v412_v3  ;;  %v814_v2 = vld [vmem:[%s1756_s2 + $0xc0] sm:$0xff] }
  0x5f   : > { %571 = vmatpush.msrb.mxu2 %v378_v4  ;;  %636 = vmatpush.msrb.mxu3 %v410_v5 }
  0x61   : > { %572 = vmatpush.msrb.mxu2 %v376_v6  ;;  %637 = vmatpush.msrb.mxu3 %v408_v7 }
  0x63   : > { %459 = vmatmul.f32.gmra.mxu0 %v1482_v8  ;;  %483 = vmatmul.f32.gmra.mxu2 %v1485_v9 }
  0x64   : > { %524 = vmatmul.f32.gmra.mxu1 %v1488_v10  ;;  %548 = vmatmul.f32.gmra.mxu3 %v1491_v11 }
  0x65   : > { %573 = vmatpush.msrb.mxu2 %v374_v12  ;;  %638 = vmatpush.msrb.mxu3 %v406_v13 }
  0x67   : > { %574 = vmatpush.msrb.mxu2 %v372_v14  ;;  %639 = vmatpush.msrb.mxu3 %v404_v15 }
  0x69   : > { %575 = vmatpush.msrb.mxu2 %v370_v16  ;;  %640 = vmatpush.msrb.mxu3 %v402_v17 }
  0x6b   : > { %462 = vmatmul.f32.gmra.mxu0 %v1498_v18  ;;  %486 = vmatmul.f32.gmra.mxu2 %v1501_v19 }
  0x6c   : > { %527 = vmatmul.f32.gmra.mxu1 %v1504_v20  ;;  %551 = vmatmul.f32.gmra.mxu3 %v1507_v21 }
  0x6d   : > { %576 = vmatpush.msrb.mxu2 %v368_v22  ;;  %641 = vmatpush.msrb.mxu3 %v400_v23  ;;  %v809_v22 = vld [vmem:[%s1756_s2 + $0x98] sm:$0xff] }
  0x73   : > { %465 = vmatmul.f32.gmra.mxu0 %v1514_v24  ;;  %489 = vmatmul.f32.gmra.mxu2 %v1517_v25 }
  0x74   : > { %530 = vmatmul.f32.gmra.mxu1 %v1520_v26  ;;  %554 = vmatmul.f32.gmra.mxu3 %v1523_v27 }
  0x7b   : > { %468 = vmatmul.f32.gmra.mxu0 %v349_v28  ;;  %492 = vmatmul.f32.gmra.mxu2 %v1531_v29 }
  0x7c   : > { %533 = vmatmul.f32.gmra.mxu1 %v350_v30  ;;  %557 = vmatmul.f32.gmra.mxu3 %v1535_v31 }
  0x83   : > { %577 = vmatmul.f32.vlgmr.msrb.gmra.mxu2 %v1418_v32  ;;  %v802_v32 = vld [vmem:[%s1756_s2 + $0x60] sm:$0xff] }
  0x84   : > { %642 = vmatmul.f32.vlgmr.msrb.gmra.mxu3 %v1424_v34  ;;  %829 = vmatpush.msrb.mxu0 %v802_v32  ;;  %v801_v34 = vld [vmem:[%s1756_s2 + $0x58] sm:$0xff] }
  0x86   : > { %830 = vmatpush.msrb.mxu0 %v801_v34 }
  0x88   : > { %831 = vmatpush.msrb.mxu0 %v800_v39 }
  0x8a   : > { %832 = vmatpush.msrb.mxu0 %v799_v40 }
  0x8b   : > { %580 = vmatmul.f32.gmra.mxu2 %v1434_v42  ;;  %v797_v42 = vld [vmem:[%s1756_s2 + $0x38] sm:$0xff] }
  0x8c   : > { %645 = vmatmul.f32.gmra.mxu3 %v1440_v44  ;;  %833 = vmatpush.msrb.mxu0 %v798_v41  ;;  %v796_v44 = vld [vmem:[%s1756_s2 + $0x30] sm:$0xff] }
  0x8e   : > { %834 = vmatpush.msrb.mxu0 %v797_v42 }
  0x90   : > { %835 = vmatpush.msrb.mxu0 %v796_v44 }
  0x92   : > { %836 = vmatpush.msrb.mxu0 %v795_v46 }
  0x93   : > { %583 = vmatmul.f32.gmra.mxu2 %v1450_v52  ;;  %v821_v52 = vld [vmem:[%s1756_s2 + $0xf8] sm:$0xff] }
  0x94   : > { %648 = vmatmul.f32.gmra.mxu3 %v1456_v54  ;;  %837 = vmatpush.msrb.mxu0 %v794_v47  ;;  %v820_v54 = vld [vmem:[%s1756_s2 + $0xf0] sm:$0xff] }
  0x95   : > { %891 = vmatpush.msrb.mxu1 %v821_v52 }
  0x96   : > { %838 = vmatpush.msrb.mxu0 %v793_v48 }
  0x97   : > { %892 = vmatpush.msrb.mxu1 %v820_v54 }
  0x98   : > { %839 = vmatpush.msrb.mxu0 %v792_v49 }
  0x99   : > { %893 = vmatpush.msrb.mxu1 %v819_v56 }
  0x9a   : > { %840 = vmatpush.msrb.mxu0 %v791_v50 }
  0x9b   : > { %586 = vmatmul.f32.gmra.mxu2 %v1466_v62  ;;  %894 = vmatpush.msrb.mxu1 %v818_v57 }
  0x9c   : > { %651 = vmatmul.f32.gmra.mxu3 %v1472_v0  ;;  %841 = vmatpush.msrb.mxu0 %v790_v51  ;;  %v815_v0 = vld [vmem:[%s1756_s2 + $0xc8] sm:$0xff] }
  0x9d   : > { %895 = vmatpush.msrb.mxu1 %v817_v58 }
  0x9f   : > { %896 = vmatpush.msrb.mxu1 %v816_v59 }
  0xa1   : > { %897 = vmatpush.msrb.mxu1 %v815_v0 }
  0xa3   : > { %589 = vmatmul.f32.gmra.mxu2 %v1482_v8  ;;  %898 = vmatpush.msrb.mxu1 %v814_v2 }
  0xa4   : > { %654 = vmatmul.f32.gmra.mxu3 %v1488_v10 }
  0xab   : > { %592 = vmatmul.f32.gmra.mxu2 %v1498_v18 }
  0xac   : > { %657 = vmatmul.f32.gmra.mxu3 %v1504_v20 }
  0xb3   : > { %595 = vmatmul.f32.gmra.mxu2 %v1514_v24 }
  0xb4   : > { %660 = vmatmul.f32.gmra.mxu3 %v1520_v26  ;;  %v807_v26 = vld [vmem:[%s1756_s2 + $0x88] sm:$0xff] }
  0xbb   : > { %598 = vmatmul.f32.gmra.mxu2 %v349_v28 }
  0xbc   : > { %663 = vmatmul.f32.gmra.mxu3 %v350_v30 }
  0xc0   : > { %v448_v60 = vpop.f32.mrf.mxu0 }
  0xc1   : > { %v513_v61 = vpop.f32.mrf.mxu1 }
  0xc2   : > { %v514_v62 = vadd.f32 %v513_v61, %v448_v60 }
  0xc3   : > { %601 = vmatmul.f32.gmra.mxu2 %v1421_v33  ;;  %v813_v33 = vld [vmem:[%s1756_s2 + $0xb8] sm:$0xff] }
  0xc4   : > { %666 = vmatmul.f32.gmra.mxu3 %v1427_v35  ;;  %842 = vmatmul.f32.vlgmr.msrb.gmra.mxu0 %v514_v62  ;;  %v812_v35 = vld [vmem:[%s1756_s2 + $0xb0] sm:$0xff] }
  0xc5   : > { %899 = vmatpush.msrb.mxu1 %v813_v33 }
  0xc6   : > { %v1627_v3 = vpop.f32.mrf.mxu2 }
  0xc7   : > { %v1629_v4 = vpop.f32.mrf.mxu3  ;;  %900 = vmatpush.msrb.mxu1 %v812_v35 }
  0xc8   : > { %v451_v5 = vpop.f32.mrf.mxu0  ;;  %v538_v48 = vadd.f32 %v1629_v4, %v1627_v3 }
  0xc9   : > { %v516_v6 = vpop.f32.mrf.mxu1 }
  0xca   : > { %v517_v7 = vadd.f32 %v516_v6, %v451_v5 }
  0xcb   : > { %604 = vmatmul.f32.gmra.mxu2 %v1437_v43  ;;  %v811_v43 = vld [vmem:[%s1756_s2 + $0xa8] sm:$0xff] }
  0xcc   : > { %669 = vmatmul.f32.gmra.mxu3 %v1443_v45  ;;  %845 = vmatmul.f32.gmra.mxu0 %v517_v7  ;;  %v810_v45 = vld [vmem:[%s1756_s2 + $0xa0] sm:$0xff] }
  0xcd   : > { %901 = vmatpush.msrb.mxu1 %v811_v43 }
  0xce   : > { %v1639_v8 = vpop.f32.mrf.mxu2 }
  0xcf   : > { %v1641_v10 = vpop.f32.mrf.mxu3  ;;  %902 = vmatpush.msrb.mxu1 %v810_v45 }
  0xd0   : > { %v454_v12 = vpop.f32.mrf.mxu0  ;;  %v541_v50 = vadd.f32 %v1641_v10, %v1639_v8 }
  0xd1   : > { %v519_v13 = vpop.f32.mrf.mxu1  ;;  %903 = vmatpush.msrb.mxu1 %v809_v22 }
  0xd2   : > { %v520_v14 = vadd.f32 %v519_v13, %v454_v12 }
  0xd3   : > { %607 = vmatmul.f32.gmra.mxu2 %v1453_v53  ;;  %v808_v53 = vld [vmem:[%s1756_s2 + $0x90] sm:$0xff] }
  0xd4   : > { %672 = vmatmul.f32.gmra.mxu3 %v1459_v55  ;;  %848 = vmatmul.f32.gmra.mxu0 %v520_v14 }
  0xd5   : > { %904 = vmatpush.msrb.mxu1 %v808_v53 }
  0xd6   : > { %v478_v15 = vpop.f32.mrf.mxu2 }
  0xd7   : > { %v543_v16 = vpop.f32.mrf.mxu3  ;;  %905 = vmatpush.msrb.mxu1 %v807_v26 }
  0xd8   : > { %v457_v17 = vpop.f32.mrf.mxu0  ;;  %v544_v54 = vadd.f32 %v543_v16, %v478_v15 }
  0xd9   : > { %v522_v18 = vpop.f32.mrf.mxu1 }
  0xda   : > { %v523_v20 = vadd.f32 %v522_v18, %v457_v17 }
  0xdb   : > { %610 = vmatmul.f32.gmra.mxu2 %v1469_v63  ;;  %v806_v63 = vld [vmem:[%s1756_s2 + $0x80] sm:$0xff] }
  0xdc   : > { %675 = vmatmul.f32.gmra.mxu3 %v1475_v1  ;;  %851 = vmatmul.f32.gmra.mxu0 %v523_v20 }
  0xdd   : > { %906 = vmatpush.msrb.mxu1 %v806_v63 }
  0xde   : > { %v481_v55 = vpop.f32.mrf.mxu2 }
  0xdf   : > { %v546_v23 = vpop.f32.mrf.mxu3 }
  0xe0   : > { %v460_v24 = vpop.f32.mrf.mxu0  ;;  %v547_v58 = vadd.f32 %v546_v23, %v481_v55 }
  0xe1   : > { %v525_v28 = vpop.f32.mrf.mxu1 }
  0xe2   : > { %v526_v30 = vadd.f32 %v525_v28, %v460_v24 }
  0xe3   : > { %613 = vmatmul.f32.gmra.mxu2 %v1485_v9 }
  0xe4   : > { %678 = vmatmul.f32.gmra.mxu3 %v1491_v11  ;;  %854 = vmatmul.f32.gmra.mxu0 %v526_v30 }
  0xe6   : > { %v484_v1 = vpop.f32.mrf.mxu2 }
  0xe7   : > { %v549_v36 = vpop.f32.mrf.mxu3 }
  0xe8   : > { %v463_v37 = vpop.f32.mrf.mxu0  ;;  %v550_v62 = vadd.f32 %v549_v36, %v484_v1 }
  0xe9   : > { %v528_v38 = vpop.f32.mrf.mxu1 }
  0xea   : > { %v529_v32 = vadd.f32 %v528_v38, %v463_v37 }
  0xeb   : > { %616 = vmatmul.f32.gmra.mxu2 %v1501_v19 }
  0xec   : > { %681 = vmatmul.f32.gmra.mxu3 %v1507_v21  ;;  %857 = vmatmul.f32.gmra.mxu0 %v529_v32 }
  0xee   : > { %v487_v34 = vpop.f32.mrf.mxu2 }
  0xef   : > { %v552_v9 = vpop.f32.mrf.mxu3 }
  0xf0   : > { %v466_v39 = vpop.f32.mrf.mxu0  ;;  %v553_v4 = vadd.f32 %v552_v9, %v487_v34 }
  0xf1   : > { %v531_v11 = vpop.f32.mrf.mxu1 }
  0xf2   : > { %v532_v40 = vadd.f32 %v531_v11, %v466_v39 }
  0xf3   : > { %619 = vmatmul.f32.gmra.mxu2 %v1517_v25 }
  0xf4   : > { %684 = vmatmul.f32.gmra.mxu3 %v1523_v27  ;;  %860 = vmatmul.f32.gmra.mxu0 %v532_v40 }
  0xf6   : > { %v490_v41 = vpop.f32.mrf.mxu2 }
  0xf7   : > { %v555_v42 = vpop.f32.mrf.mxu3 }
  0xf8   : > { %v469_v44 = vpop.f32.mrf.mxu0  ;;  %v556_v33 = vadd.f32 %v555_v42, %v490_v41 }
  0xf9   : > { %v534_v46 = vpop.f32.mrf.mxu1 }
  0xfa   : > { %v535_v47 = vadd.f32 %v534_v46, %v469_v44  ;;  %v1681_v44 = vld [vmem:[%s1757_s3] ss:$0 sm:$0xff] }
  0xfb   : > { %622 = vmatmul.f32.gmra.mxu2 %v1531_v29 }
  0xfc   : > { %687 = vmatmul.f32.gmra.mxu3 %v1535_v31  ;;  %863 = vmatmul.f32.gmra.mxu0 %v535_v47 }
  0xfe   : > { %v493_v19 = vpop.f32.mrf.mxu2 }
  0xff   : > { %v558_v21 = vpop.f32.mrf.mxu3 }
 0x100   : > { %v559_v12 = vadd.f32 %v558_v21, %v493_v19 }
 0x104   : > { %866 = vmatmul.f32.gmra.mxu0 %v538_v48 }
 0x106   : > { %v578_v25 = vpop.f32.mrf.mxu2 }
 0x107   : > { %v643_v49 = vpop.f32.mrf.mxu3 }
 0x108   : > { %v644_v27 = vadd.f32 %v643_v49, %v578_v25 }
 0x10a   : > { %907 = vmatmul.f32.vlgmr.msrb.gmra.mxu1 %v644_v27 }
 0x10c   : > { %869 = vmatmul.f32.gmra.mxu0 %v541_v50 }
 0x10e   : > { %v581_v51 = vpop.f32.mrf.mxu2 }
 0x10f   : > { %v646_v52 = vpop.f32.mrf.mxu3 }
 0x110   : > { %v647_v29 = vadd.f32 %v646_v52, %v581_v51 }
 0x112   : > { %910 = vmatmul.f32.gmra.mxu1 %v647_v29 }
 0x114   : > { %872 = vmatmul.f32.gmra.mxu0 %v544_v54 }
 0x116   : > { %v584_v31 = vpop.f32.mrf.mxu2 }
 0x117   : > { %v649_v56 = vpop.f32.mrf.mxu3 }
 0x118   : > { %v650_v57 = vadd.f32 %v649_v56, %v584_v31 }
 0x11a   : > { %913 = vmatmul.f32.gmra.mxu1 %v650_v57 }
 0x11c   : > { %875 = vmatmul.f32.gmra.mxu0 %v547_v58 }
 0x11e   : > { %v587_v59 = vpop.f32.mrf.mxu2 }
 0x11f   : > { %v652_v60 = vpop.f32.mrf.mxu3 }
 0x120   : > { %v653_v61 = vadd.f32 %v652_v60, %v587_v59 }
 0x122   : > { %916 = vmatmul.f32.gmra.mxu1 %v653_v61 }
 0x124   : > { %878 = vmatmul.f32.gmra.mxu0 %v550_v62 }
 0x126   : > { %v590_v0 = vpop.f32.mrf.mxu2 }
 0x127   : > { %v655_v2 = vpop.f32.mrf.mxu3 }
 0x128   : > { %v656_v3 = vadd.f32 %v655_v2, %v590_v0 }
 0x12a   : > { %919 = vmatmul.f32.gmra.mxu1 %v656_v3 }
 0x12c   : > { %881 = vmatmul.f32.gmra.mxu0 %v553_v4 }
 0x12e   : > { %v593_v5 = vpop.f32.mrf.mxu2 }
 0x12f   : > { %v658_v6 = vpop.f32.mrf.mxu3 }
 0x130   : > { %v659_v7 = vadd.f32 %v658_v6, %v593_v5 }
 0x132   : > { %922 = vmatmul.f32.gmra.mxu1 %v659_v7 }
 0x134   : > { %884 = vmatmul.f32.gmra.mxu0 %v556_v33 }
 0x136   : > { %v596_v35 = vpop.f32.mrf.mxu2 }
 0x137   : > { %v661_v8 = vpop.f32.mrf.mxu3 }
 0x138   : > { %v662_v10 = vadd.f32 %v661_v8, %v596_v35 }
 0x13a   : > { %925 = vmatmul.f32.gmra.mxu1 %v662_v10 }
 0x13c   : > { %887 = vmatmul.f32.gmra.mxu0 %v559_v12 }
 0x13e   : > { %v599_v13 = vpop.f32.mrf.mxu2 }
 0x13f   : > { %v664_v14 = vpop.f32.mrf.mxu3 }
 0x140   : > { %v665_v43 = vadd.f32 %v664_v14, %v599_v13 }
 0x141   : > { %v843_v28 = vpop.f32.mrf.mxu0 }
 0x142   : > { %928 = vmatmul.f32.gmra.mxu1 %v665_v43  ;;  %v844_v47 = vadd.f32 %v1681_v44, %v843_v28 }
 0x146   : > { %v602_v45 = vpop.f32.mrf.mxu2 }
 0x147   : > { %v667_v15 = vpop.f32.mrf.mxu3 }
 0x148   : > { %v668_v16 = vadd.f32 %v667_v15, %v602_v45 }
 0x149   : > { %v846_v37 = vpop.f32.mrf.mxu0 }
 0x14a   : > { %931 = vmatmul.f32.gmra.mxu1 %v668_v16  ;;  %v847_v48 = vadd.f32 %v1681_v44, %v846_v37 }
 0x14e   : > { %v605_v17 = vpop.f32.mrf.mxu2 }
 0x14f   : > { %v670_v18 = vpop.f32.mrf.mxu3 }
 0x150   : > { %v671_v20 = vadd.f32 %v670_v18, %v605_v17 }
 0x151   : > { %v849_v11 = vpop.f32.mrf.mxu0 }
 0x152   : > { %934 = vmatmul.f32.gmra.mxu1 %v671_v20  ;;  %v850_v50 = vadd.f32 %v1681_v44, %v849_v11 }
 0x156   : > { %v608_v22 = vpop.f32.mrf.mxu2 }
 0x157   : > { %v673_v53 = vpop.f32.mrf.mxu3 }
 0x158   : > { %v674_v55 = vadd.f32 %v673_v53, %v608_v22 }
 0x159   : > { %v852_v46 = vpop.f32.mrf.mxu0 }
 0x15a   : > { %937 = vmatmul.f32.gmra.mxu1 %v674_v55  ;;  %v853_v54 = vadd.f32 %v1681_v44, %v852_v46 }
 0x15e   : > { %v611_v23 = vpop.f32.mrf.mxu2 }
 0x15f   : > { %v676_v24 = vpop.f32.mrf.mxu3 }
 0x160   : > { %v677_v26 = vadd.f32 %v676_v24, %v611_v23 }
 0x161   : > { %v855_v25 = vpop.f32.mrf.mxu0 }
 0x162   : > { %940 = vmatmul.f32.gmra.mxu1 %v677_v26  ;;  %v856_v58 = vadd.f32 %v1681_v44, %v855_v25 }
 0x166   : > { %v614_v30 = vpop.f32.mrf.mxu2 }
 0x167   : > { %v679_v63 = vpop.f32.mrf.mxu3 }
 0x168   : > { %v680_v1 = vadd.f32 %v679_v63, %v614_v30 }
 0x169   : > { %v858_v51 = vpop.f32.mrf.mxu0 }
 0x16a   : > { %943 = vmatmul.f32.gmra.mxu1 %v680_v1  ;;  %v859_v62 = vadd.f32 %v1681_v44, %v858_v51 }
 0x16e   : > { %v617_v36 = vpop.f32.mrf.mxu2 }
 0x16f   : > { %v682_v38 = vpop.f32.mrf.mxu3 }
 0x170   : > { %v683_v32 = vadd.f32 %v682_v38, %v617_v36 }
 0x171   : > { %v861_v57 = vpop.f32.mrf.mxu0 }
 0x172   : > { %946 = vmatmul.f32.gmra.mxu1 %v683_v32  ;;  %v862_v3 = vadd.f32 %v1681_v44, %v861_v57 }
 0x176   : > { %v620_v34 = vpop.f32.mrf.mxu2 }
 0x177   : > { %v685_v9 = vpop.f32.mrf.mxu3 }
 0x178   : > { %v686_v39 = vadd.f32 %v685_v9, %v620_v34 }
 0x179   : > { %v864_v61 = vpop.f32.mrf.mxu0 }
 0x17a   : > { %949 = vmatmul.f32.gmra.mxu1 %v686_v39  ;;  %v865_v7 = vadd.f32 %v1681_v44, %v864_v61 }
 0x17e   : > { %v623_v40 = vpop.f32.mrf.mxu2 }
 0x17f   : > { %v688_v41 = vpop.f32.mrf.mxu3 }
 0x180   : > { %v689_v42 = vadd.f32 %v688_v41, %v623_v40 }
 0x181   : > { %v867_v4 = vpop.f32.mrf.mxu0 }
 0x182   : > { %952 = vmatmul.f32.gmra.mxu1 %v689_v42  ;;  %v868_v10 = vadd.f32 %v1681_v44, %v867_v4 }
 0x187   : > { %v908_v19 = vpop.f32.mrf.mxu1 }
 0x188   : > { %v909_v21 = vadd.f32 %v908_v19, %v844_v47 }
 0x189   : > { %v870_v33 = vpop.f32.mrf.mxu0 }
 0x18a   : > { %957 = vst.msk [vmem:[%s1687_s18] sm:$0xff] %vm956_vm0, %v909_v21  ;;  %v871_v43 = vadd.f32 %v1681_v44, %v870_v33 }
 0x18f   : > { %v911_v49 = vpop.f32.mrf.mxu1 }
 0x190   : > { %v912_v27 = vadd.f32 %v911_v49, %v847_v48 }
 0x191   : > { %v873_v14 = vpop.f32.mrf.mxu0 }
 0x192   : > { %958 = vst.msk [vmem:[%s1687_s18 + $0x8] sm:$0xff] %vm956_vm0, %v912_v27  ;;  %v874_v17 = vadd.f32 %v1681_v44, %v873_v14 }
 0x197   : > { %v914_v52 = vpop.f32.mrf.mxu1 }
 0x198   : > { %v915_v29 = vadd.f32 %v914_v52, %v850_v50 }
 0x199   : > { %v876_v16 = vpop.f32.mrf.mxu0 }
 0x19a   : > { %959 = vst.msk [vmem:[%s1687_s18 + $0x10] sm:$0xff] %vm956_vm0, %v915_v29  ;;  %v877_v53 = vadd.f32 %v1681_v44, %v876_v16 }
 0x19f   : > { %v917_v31 = vpop.f32.mrf.mxu1 }
 0x1a0   : > { %v918_v56 = vadd.f32 %v917_v31, %v853_v54 }
 0x1a1   : > { %v879_v22 = vpop.f32.mrf.mxu0 }
 0x1a2   : > { %960 = vst.msk [vmem:[%s1687_s18 + $0x18] sm:$0xff] %vm956_vm0, %v918_v56  ;;  %v880_v24 = vadd.f32 %v1681_v44, %v879_v22 }
 0x1a7   : > { %v920_v59 = vpop.f32.mrf.mxu1 }
 0x1a8   : > { %v921_v60 = vadd.f32 %v920_v59, %v856_v58 }
 0x1a9   : > { %v882_v26 = vpop.f32.mrf.mxu0 }
 0x1aa   : > { %961 = vst.msk [vmem:[%s1687_s18 + $0x20] sm:$0xff] %vm956_vm0, %v921_v60  ;;  %v883_v63 = vadd.f32 %v1681_v44, %v882_v26 }
 0x1af   : > { %v923_v0 = vpop.f32.mrf.mxu1 }
 0x1b0   : > { %v924_v2 = vadd.f32 %v923_v0, %v859_v62 }
 0x1b1   : > { %v885_v37 = vpop.f32.mrf.mxu0 }
 0x1b2   : > { %962 = vst.msk [vmem:[%s1687_s18 + $0x28] sm:$0xff] %vm956_vm0, %v924_v2  ;;  %v886_v38 = vadd.f32 %v1681_v44, %v885_v37 }
 0x1b7   : > { %v926_v5 = vpop.f32.mrf.mxu1 }
 0x1b8   : > { %v927_v6 = vadd.f32 %v926_v5, %v862_v3 }
 0x1b9   : > { %v888_v9 = vpop.f32.mrf.mxu0 }
 0x1ba   : > { %963 = vst.msk [vmem:[%s1687_s18 + $0x30] sm:$0xff] %vm956_vm0, %v927_v6  ;;  %v889_v39 = vadd.f32 %v1681_v44, %v888_v9 }
 0x1bf   : > { %v929_v35 = vpop.f32.mrf.mxu1 }
 0x1c0   : > { %v930_v8 = vadd.f32 %v929_v35, %v865_v7 }
 0x1c2   : > { %964 = vst.msk [vmem:[%s1687_s18 + $0x38] sm:$0xff] %vm956_vm0, %v930_v8 }
 0x1c7   : > { %v932_v12 = vpop.f32.mrf.mxu1 }
 0x1c8   : > { %v933_v13 = vadd.f32 %v932_v12, %v868_v10 }
 0x1ca   : > { %965 = vst.msk [vmem:[%s1687_s18 + $0x40] sm:$0xff] %vm956_vm0, %v933_v13 }
 0x1cf   : > { %v935_v45 = vpop.f32.mrf.mxu1 }
 0x1d0   : > { %v936_v15 = vadd.f32 %v935_v45, %v871_v43 }
 0x1d2   : > { %966 = vst.msk [vmem:[%s1687_s18 + $0x48] sm:$0xff] %vm956_vm0, %v936_v15 }
 0x1d7   : > { %v938_v18 = vpop.f32.mrf.mxu1 }
 0x1d8   : > { %v939_v20 = vadd.f32 %v938_v18, %v874_v17 }
 0x1da   : > { %967 = vst.msk [vmem:[%s1687_s18 + $0x50] sm:$0xff] %vm956_vm0, %v939_v20 }
 0x1df   : > { %v941_v55 = vpop.f32.mrf.mxu1 }
 0x1e0   : > { %v942_v23 = vadd.f32 %v941_v55, %v877_v53 }
 0x1e2   : > { %968 = vst.msk [vmem:[%s1687_s18 + $0x58] sm:$0xff] %vm956_vm0, %v942_v23 }
 0x1e7   : > { %v944_v28 = vpop.f32.mrf.mxu1 }
 0x1e8   : > { %v945_v30 = vadd.f32 %v944_v28, %v880_v24 }
 0x1ea   : > { %969 = vst.msk [vmem:[%s1687_s18 + $0x60] sm:$0xff] %vm956_vm0, %v945_v30 }
 0x1ef   : > { %v947_v1 = vpop.f32.mrf.mxu1 }
 0x1f0   : > { %v948_v36 = vadd.f32 %v947_v1, %v883_v63 }
 0x1f2   : > { %970 = vst.msk [vmem:[%s1687_s18 + $0x68] sm:$0xff] %vm956_vm0, %v948_v36 }
 0x1f7   : > { %v950_v32 = vpop.f32.mrf.mxu1 }
 0x1f8   : > { %v951_v34 = vadd.f32 %v950_v32, %v886_v38 }
 0x1fa   : > { %971 = vst.msk [vmem:[%s1687_s18 + $0x70] sm:$0xff] %vm956_vm0, %v951_v34 }
 0x1ff   : > { %v953_v11 = vpop.f32.mrf.mxu1 }
 0x200   : > { %v954_v40 = vadd.f32 %v953_v11, %v889_v39 }
 0x202   : > { %972 = vst.msk [vmem:[%s1687_s18 + $0x78] sm:$0xff] %vm956_vm0, %v954_v40 }
 0x203 PF: > { %s18_s20 = sadd.s32 1, %s1297_s20   ;;  %s1765_s15 = smov %s1281_s16 }
 0x204   : > { %p15_p2 = scmp.ge.s32.totalorder %s18_s20, 4   ;;  %s1766_s16 = smov %s1285_s17 }
 0x205   : > { %s1767_s17 = smov %s1397_s13  ;;  %s1768_s18 = smov %s1293_s19 }
 0x206   : > { %s1769_s19 = smov %s1771_s6  ;;  %17 = sbr.rel (!%p15_p2) target bundleno = 7 (0x7), region = 89 }
 0x20b   :  { %995 = vsyncpa [#allocation4], 1 }
 0x20c   :  { %997 = vsyncpa [#allocation4 + $0x1], 1 }
 0x20d   :  { %998 = vsyncpa [#allocation6], 1 }

</bundles_post_ra>
